<compile_context>
chip_gen: v7x
topology: tpu7x:2x2x1
jax: 0.10.0
libtpu: 0.0.40
codegen_flags: <defaults>
</compile_context>

<pallas_src>
import functools

import jax
import jax.numpy as jnp
import numpy as np
from jax.experimental import pallas as pl
from jax.experimental.pallas import tpu as pltpu

_MAX_TILE = 2048   # pixels per grid step on the lane axis (multiple of 128)


def _tiling(hw):
    """Choose (tile, tiles, padded_hw) for hw pixels per image."""
    hw128 = ((hw + 127) // 128) * 128
    tile = min(_MAX_TILE, hw128)
    tiles = (hw128 + tile - 1) // tile
    return tile, tiles, tiles * tile


def _lane_fold(x):
    """Sum 128-wide lane chunks of a (rows, T) block -> (rows, 128) partial."""
    t = x.shape[-1]
    acc = x[:, 0:128]
    for g in range(1, t // 128):
        acc = acc + x[:, g * 128:(g + 1) * 128]
    return acc


# ----------------------------------------------------------------------------
# Fused kernel: softmax stats for OHEM CE + per-class Dice sums, single pass
# over the logits.  Kernel view: logits (C, T) — classes on sublanes, pixels
# on lanes.  Grid = (batch [parallel], pixel-tiles [arbitrary]).
# ----------------------------------------------------------------------------
def _fused_kernel(x_ref, t_ref, mp_ref, dlt_ref, ced_ref,
                  inter_ref, psq_ref, cnt_ref, *, double_softmax):
    i = pl.program_id(1)

    @pl.when(i == 0)
    def _():
        ced_ref[...] = jnp.zeros_like(ced_ref)
        inter_ref[...] = jnp.zeros_like(inter_ref)
        psq_ref[...] = jnp.zeros_like(psq_ref)
        cnt_ref[...] = jnp.zeros_like(cnt_ref)

    x = x_ref[...].astype(jnp.float32)                  # (C, T)
    t = t_ref[...]                                      # (1, T) int32, -1 = pad
    valid = t >= 0
    validf = valid.astype(jnp.float32)                  # (1, T)

    # softmax over classes (sublane axis)
    m = jnp.max(x, axis=0, keepdims=True)               # (1, T)
    e = jnp.exp(x - m)
    s = jnp.sum(e, axis=0, keepdims=True)               # (1, T)
    p = e / s                                           # (C, T)
    lse = m + jnp.log(s)                                # (1, T) logsumexp

    cls = jax.lax.broadcasted_iota(jnp.int32, x.shape, 0)
    onehot = (cls == t).astype(jnp.float32)             # (C, T); all-0 for pads

    x0 = x[0:1, :]                                      # logit of class 0
    xt = jnp.sum(x * onehot, axis=0, keepdims=True)     # logit @ target
    mp = jnp.sum(p * onehot, axis=0, keepdims=True)     # softmax prob @ target

    # Per-pixel CE statistics (lane-dense stores).  Padded pixels: mp=+inf so
    # they never enter the k-smallest selection, delta=0 so they never add.
    mp_ref[...] = jnp.where(valid, mp, jnp.inf)
    dlt_ref[...] = (xt - x0) * validf                   # CE_drop - CE_keep
    ced_ref[...] += _lane_fold((lse - x0) * validf)     # sum CE with label->0

    # Dice sums.  In the no-aux branch the reference feeds softmax(pred) to
    # DiceLoss, which applies softmax again -> do it in-register.
    if double_softmax:
        e2 = jnp.exp(p - jnp.max(p, axis=0, keepdims=True))
        pd = e2 / jnp.sum(e2, axis=0, keepdims=True)
    else:
        pd = p
    inter_ref[...] += _lane_fold(pd * onehot)           # (C, 128) lane partials
    psq_ref[...] += _lane_fold(pd * pd * validf)
    cnt_ref[...] += _lane_fold(onehot)


def _fused_stats(x, t, tile, tiles, double_softmax):
    b, c, hw_pad = x.shape
    x_spec = pl.BlockSpec((None, c, tile), lambda bi, i: (bi, 0, i))
    px_spec = pl.BlockSpec((None, 1, tile), lambda bi, i: (bi, 0, i))
    acc1_spec = pl.BlockSpec((None, 1, 128), lambda bi, i: (bi, 0, 0))
    accc_spec = pl.BlockSpec((None, c, 128), lambda bi, i: (bi, 0, 0))
    kernel = functools.partial(_fused_kernel, double_softmax=double_softmax)
    return pl.pallas_call(
        kernel,
        out_shape=(
            jax.ShapeDtypeStruct((b, 1, hw_pad), jnp.float32),   # mp
            jax.ShapeDtypeStruct((b, 1, hw_pad), jnp.float32),   # delta
            jax.ShapeDtypeStruct((b, 1, 128), jnp.float32),      # sum ce_drop
            jax.ShapeDtypeStruct((b, c, 128), jnp.float32),      # dice inter
            jax.ShapeDtypeStruct((b, c, 128), jnp.float32),      # dice p^2 sum
            jax.ShapeDtypeStruct((b, c, 128), jnp.float32),      # dice class cnt
        ),
        grid_spec=pltpu.PrefetchScalarGridSpec(
            num_scalar_prefetch=0,
            grid=(b, tiles),
            in_specs=[x_spec, px_spec],
            out_specs=[px_spec, px_spec, acc1_spec, accc_spec, accc_spec,
                       accc_spec],
        ),
        compiler_params=pltpu.CompilerParams(
            dimension_semantics=("parallel", "arbitrary")),
    )(x, t)


# ----------------------------------------------------------------------------
# Second (tiny) pass: sum of delta over OHEM-kept pixels (threshold in SMEM).
# ----------------------------------------------------------------------------
def _kept_kernel(thr_ref, mp_ref, dlt_ref, out_ref):
    i = pl.program_id(1)

    @pl.when(i == 0)
    def _():
        out_ref[...] = jnp.zeros_like(out_ref)

    thr = thr_ref[0, 0]
    kept = (mp_ref[...] <= thr).astype(jnp.float32)     # pads: delta already 0
    out_ref[...] += _lane_fold(kept * dlt_ref[...])     # (1, 128) lane partials


def _kept_delta_sum(threshold, mp, dlt, tile, tiles):
    b = mp.shape[0]
    thr = jnp.asarray(threshold, jnp.float32).reshape(1, 1)
    px_spec = pl.BlockSpec((None, 1, tile), lambda bi, i: (bi, 0, i))
    out = pl.pallas_call(
        _kept_kernel,
        out_shape=jax.ShapeDtypeStruct((b, 1, 128), jnp.float32),
        grid_spec=pltpu.PrefetchScalarGridSpec(
            num_scalar_prefetch=0,
            grid=(b, tiles),
            in_specs=[pl.BlockSpec(memory_space=pltpu.MemorySpace.SMEM),
                      px_spec, px_spec],
            out_specs=pl.BlockSpec((None, 1, 128), lambda bi, i: (bi, 0, 0)),
        ),
        compiler_params=pltpu.CompilerParams(
            dimension_semantics=("parallel", "arbitrary")),
    )(thr, mp, dlt)
    return jnp.sum(out)


# ----------------------------------------------------------------------------
# Glue reproducing the module semantics
# ----------------------------------------------------------------------------
def _ohem_threshold(mp_flat, n_valid, thresh, min_kept):
    """max(thresh, k-th smallest true-class prob); pads (+inf) never selected."""
    if (min_kept > n_valid) or (n_valid <= 0) or (min_kept <= 0):
        return jnp.float32(jnp.inf)                     # no hard-example mining
    k = min(n_valid, int(min_kept))
    neg_topk, _ = jax.lax.top_k(-mp_flat, k)
    kth = -neg_topk[k - 1]
    return jnp.maximum(jnp.float32(thresh), kth)


def _ohem_ce_and_dice(pred_nchw, target_bhw, thresh, min_kept,
                      double_softmax, smooth=1e-5):
    """Returns (OHEM mean CE, Dice loss) with one fused pass over the logits."""
    b, c, h, w = pred_nchw.shape
    hw = h * w
    n = b * hw
    # natural layout, no transpose: (B, C, H*W), pixels on the lane axis
    x = pred_nchw.reshape(b, c, hw).astype(jnp.float32)
    t = target_bhw.reshape(b, 1, hw).astype(jnp.int32)

    tile, tiles, hw_pad = _tiling(hw)
    if hw_pad > hw:
        x = jnp.pad(x, ((0, 0), (0, 0), (0, hw_pad - hw)))
        t = jnp.pad(t, ((0, 0), (0, 0), (0, hw_pad - hw)), constant_values=-1)

    mp, dlt, ced_acc, inter_acc, psq_acc, cnt_acc = _fused_stats(
        x, t, tile, tiles, double_softmax)

    # Dice loss from per-batch / per-lane partial sums
    inter = jnp.sum(inter_acc, axis=(0, 2))
    psq = jnp.sum(psq_acc, axis=(0, 2))
    cnt = jnp.sum(cnt_acc, axis=(0, 2))
    dice = 1.0 - jnp.mean(2.0 * inter / (psq + cnt + smooth))

    # OHEM threshold + masked mean CE (reduction='mean' over all pixels):
    #   CE(pixel) = (lse - x0) - kept * (x_t - x0)
    threshold = _ohem_threshold(mp.reshape(-1), n, thresh, min_kept)
    ce_drop_sum = jnp.sum(ced_acc)
    kept_delta = _kept_delta_sum(threshold, mp, dlt, tile, tiles)
    ce_mean = (ce_drop_sum - kept_delta) / jnp.float32(n)
    return ce_mean, dice


def criterion_ohem(preds, target, aux_weight, thresh=0.7, min_kept=256,
                   use_weight=False, ce_weight=0.5, dice_weight=0.5):
    """CriterionOhem.forward."""
    # TODO(synk): use_weight=True (class weights [1.0, 90.0]) not implemented;
    #             default (use_weight=False) matches plain mean CE.
    del use_weight
    target = jnp.where(jnp.max(target) == 255, target // 255, target).astype(jnp.int32)

    if aux_weight > 0:
        main_pred, aux_pred = preds
        ce1, dice1 = _ohem_ce_and_dice(main_pred, target, thresh, min_kept,
                                       double_softmax=False)
        ce2, dice2 = _ohem_ce_and_dice(aux_pred, target, thresh, min_kept,
                                       double_softmax=False)
        loss1 = ce_weight * ce1 + dice_weight * dice1
        loss2 = ce_weight * ce2 + dice_weight * dice2
        return loss1 + aux_weight * loss2
    else:
        # Reference: ce_loss + dice_weight * DiceLoss(softmax(pred), target),
        # i.e. the Dice softmax is applied on top of softmax(pred).
        ce, dice = _ohem_ce_and_dice(preds, target, thresh, min_kept,
                                     double_softmax=True)
        return ce + dice_weight * dice


# ----------------------------------------------------------------------------
# Pure-JAX reference (mirrors the PyTorch code) for correctness checks
# ----------------------------------------------------------------------------
def _ref_dice(x, t, smooth=1e-5):
    p = jax.nn.softmax(x, axis=1)
    c = x.shape[1]
    oh = jnp.transpose(jax.nn.one_hot(t, c, dtype=jnp.float32), (0, 3, 1, 2))
    dims = (0, 2, 3)
    inter = jnp.sum(p * oh, dims)
    card = jnp.sum(p * p, dims) + jnp.sum(oh * oh, dims)
    return 1.0 - jnp.mean(2.0 * inter / (card + smooth))


def _ref_ohem_ce(pred, t, thresh, min_kept):
    b, c, h, w = pred.shape
    tflat = t.reshape(-1)
    N = tflat.shape[0]
    prob = jnp.transpose(jax.nn.softmax(pred, axis=1), (1, 0, 2, 3)).reshape(c, -1)
    if min_kept <= N and N > 0:
        mp = prob[tflat, jnp.arange(N)]
        threshold = jnp.float32(thresh)
        if min_kept > 0:
            kth = jnp.sort(mp)[min(N, min_kept) - 1]
            threshold = jnp.maximum(threshold, kth)
            kept = mp <= threshold
            tflat = tflat * kept.astype(tflat.dtype)
    t_mod = tflat.reshape(b, h, w)
    logp = jax.nn.log_softmax(pred, axis=1)
    oh = jnp.transpose(jax.nn.one_hot(t_mod, c, dtype=jnp.float32), (0, 3, 1, 2))
    return jnp.mean(-jnp.sum(logp * oh, axis=1))


def _ref_criterion_aux(preds, target, aux_weight, thresh, min_kept,
                       ce_weight, dice_weight):
    target = jnp.where(jnp.max(target) == 255, target // 255, target).astype(jnp.int32)
    main_pred, aux_pred = preds
    loss1 = (ce_weight * _ref_ohem_ce(main_pred, target, thresh, min_kept)
             + dice_weight * _ref_dice(main_pred, target))
    loss2 = (ce_weight * _ref_ohem_ce(aux_pred, target, thresh, min_kept)
             + dice_weight * _ref_dice(aux_pred, target))
    return loss1 + aux_weight * loss2


def _ref_criterion_single(pred, target, thresh, min_kept, dice_weight):
    target = jnp.where(jnp.max(target) == 255, target // 255, target).astype(jnp.int32)
    ce = _ref_ohem_ce(pred, target, thresh, min_kept)
    dl = _ref_dice(jax.nn.softmax(pred, axis=1), target)
    return ce + dice_weight * dl


# ----------------------------------------------------------------------------
if __name__ == "__main__":
    key = jax.random.PRNGKey(0)
    k1, k2, k3 = jax.random.split(key, 3)

    B, C, H, W = 2, 4, 16, 16          # N = B*H*W = 512 pixels
    aux_weight = 0.4
    thresh = 0.7
    min_kept = 200                      # < N so the OHEM path is exercised
    ce_weight = 0.5
    dice_weight = 0.5

    main_pred = jax.random.normal(k1, (B, C, H, W), dtype=jnp.float32) * 2.0
    aux_pred = jax.random.normal(k2, (B, C, H, W), dtype=jnp.float32) * 2.0
    target = jax.random.randint(k3, (B, H, W), 0, C, dtype=jnp.int32)

    # aux branch (two predictions)
    loss_aux = criterion_ohem((main_pred, aux_pred), target, aux_weight,
                              thresh=thresh, min_kept=min_kept,
                              ce_weight=ce_weight, dice_weight=dice_weight)
    # no-aux branch (single prediction, double-softmax dice path)
    loss_single = criterion_ohem(main_pred, target, 0.0,
                                 thresh=thresh, min_kept=min_kept,
                                 ce_weight=ce_weight, dice_weight=dice_weight)
    loss_aux, loss_single = jax.block_until_ready((loss_aux, loss_single))

    ref_aux = jax.block_until_ready(
        _ref_criterion_aux((main_pred, aux_pred), target, aux_weight,
                           thresh, min_kept, ce_weight, dice_weight))
    ref_single = jax.block_until_ready(
        _ref_criterion_single(main_pred, target, thresh, min_kept, dice_weight))

    np.testing.assert_allclose(np.asarray(loss_aux), np.asarray(ref_aux),
                               rtol=1e-5, atol=1e-5)
    np.testing.assert_allclose(np.asarray(loss_single), np.asarray(ref_single),
                               rtol=1e-5, atol=1e-5)
    print("KERNEL_OK")
</pallas_src>

<mosaic_0001>
module attributes {stable_mosaic.version = 11 : i64} {
  func.func @_fused_kernel(%arg0: i32, %arg1: i32, %arg2: memref<1x4x256xf32, #tpu.memory_space<vmem>>, %arg3: memref<1x1x256xi32, #tpu.memory_space<vmem>>, %arg4: memref<1x1x256xf32, #tpu.memory_space<vmem>>, %arg5: memref<1x1x256xf32, #tpu.memory_space<vmem>>, %arg6: memref<1x1x128xf32, #tpu.memory_space<vmem>>, %arg7: memref<1x4x128xf32, #tpu.memory_space<vmem>>, %arg8: memref<1x4x128xf32, #tpu.memory_space<vmem>>, %arg9: memref<1x4x128xf32, #tpu.memory_space<vmem>>) attributes {dimension_semantics = [#tpu.dimension_semantics<parallel>, #tpu.dimension_semantics<arbitrary>], iteration_bounds = array<i64: 2, 1>, scalar_prefetch = 0 : i64, scratch_operands = 0 : i64, tpu.core_type = #tpu.core_type<tc>, window_params = [{transform_indices = @transform_0, window_bounds = array<i64: 1, 4, 256>}, {transform_indices = @transform_1, window_bounds = array<i64: 1, 1, 256>}, {transform_indices = @transform_2, window_bounds = array<i64: 1, 1, 256>}, {transform_indices = @transform_3, window_bounds = array<i64: 1, 1, 256>}, {transform_indices = @transform_4, window_bounds = array<i64: 1, 1, 128>}, {transform_indices = @transform_5, window_bounds = array<i64: 1, 4, 128>}, {transform_indices = @transform_6, window_bounds = array<i64: 1, 4, 128>}, {transform_indices = @transform_7, window_bounds = array<i64: 1, 4, 128>}]} {
    %c0_i32 = arith.constant 0 : i32
    %0 = arith.cmpi eq, %arg1, %c0_i32 : i32
    %1 = arith.extui %0 : i1 to i32
    %c0_i32_0 = arith.constant 0 : i32
    %2 = arith.cmpi ne, %1, %c0_i32_0 : i32
    scf.if %2 {
      %cst_41 = arith.constant 0.000000e+00 : f32
      %86 = vector.broadcast %cst_41 : f32 to vector<1x128xf32>
      %c0_42 = arith.constant 0 : index
      %c0_43 = arith.constant 0 : index
      %c0_44 = arith.constant 0 : index
      %87 = vector.load %arg6[%c0_42, %c0_43, %c0_44] : memref<1x1x128xf32, #tpu.memory_space<vmem>>, vector<1x1x128xf32>
      %88 = vector.shape_cast %87 : vector<1x1x128xf32> to vector<1x128xf32>
      %89 = vector.shape_cast %86 : vector<1x128xf32> to vector<1x1x128xf32>
      tpu.vector_store %arg6[%c0_42, %c0_43, %c0_44], %89 {strides = array<i32>} : memref<1x1x128xf32, #tpu.memory_space<vmem>>, vector<1x1x128xf32>,
      %cst_45 = arith.constant 0.000000e+00 : f32
      %90 = vector.broadcast %cst_45 : f32 to vector<4x128xf32>
      %c0_46 = arith.constant 0 : index
      %c0_47 = arith.constant 0 : index
      %c0_48 = arith.constant 0 : index
      %91 = vector.load %arg7[%c0_46, %c0_47, %c0_48] : memref<1x4x128xf32, #tpu.memory_space<vmem>>, vector<1x4x128xf32>
      %92 = vector.shape_cast %91 : vector<1x4x128xf32> to vector<4x128xf32>
      %93 = vector.shape_cast %90 : vector<4x128xf32> to vector<1x4x128xf32>
      tpu.vector_store %arg7[%c0_46, %c0_47, %c0_48], %93 {strides = array<i32>} : memref<1x4x128xf32, #tpu.memory_space<vmem>>, vector<1x4x128xf32>,
      %cst_49 = arith.constant 0.000000e+00 : f32
      %94 = vector.broadcast %cst_49 : f32 to vector<4x128xf32>
      %c0_50 = arith.constant 0 : index
      %c0_51 = arith.constant 0 : index
      %c0_52 = arith.constant 0 : index
      %95 = vector.load %arg8[%c0_50, %c0_51, %c0_52] : memref<1x4x128xf32, #tpu.memory_space<vmem>>, vector<1x4x128xf32>
      %96 = vector.shape_cast %95 : vector<1x4x128xf32> to vector<4x128xf32>
      %97 = vector.shape_cast %94 : vector<4x128xf32> to vector<1x4x128xf32>
      tpu.vector_store %arg8[%c0_50, %c0_51, %c0_52], %97 {strides = array<i32>} : memref<1x4x128xf32, #tpu.memory_space<vmem>>, vector<1x4x128xf32>,
      %cst_53 = arith.constant 0.000000e+00 : f32
      %98 = vector.broadcast %cst_53 : f32 to vector<4x128xf32>
      %c0_54 = arith.constant 0 : index
      %c0_55 = arith.constant 0 : index
      %c0_56 = arith.constant 0 : index
      %99 = vector.load %arg9[%c0_54, %c0_55, %c0_56] : memref<1x4x128xf32, #tpu.memory_space<vmem>>, vector<1x4x128xf32>
      %100 = vector.shape_cast %99 : vector<1x4x128xf32> to vector<4x128xf32>
      %101 = vector.shape_cast %98 : vector<4x128xf32> to vector<1x4x128xf32>
      tpu.vector_store %arg9[%c0_54, %c0_55, %c0_56], %101 {strides = array<i32>} : memref<1x4x128xf32, #tpu.memory_space<vmem>>, vector<1x4x128xf32>,
    } else {
    }
    %c0 = arith.constant 0 : index
    %c0_1 = arith.constant 0 : index
    %c0_2 = arith.constant 0 : index
    %3 = vector.load %arg2[%c0, %c0_1, %c0_2] : memref<1x4x256xf32, #tpu.memory_space<vmem>>, vector<1x4x256xf32>
    %4 = vector.shape_cast %3 : vector<1x4x256xf32> to vector<4x256xf32>
    %c0_3 = arith.constant 0 : index
    %c0_4 = arith.constant 0 : index
    %c0_5 = arith.constant 0 : index
    %5 = vector.load %arg3[%c0_3, %c0_4, %c0_5] : memref<1x1x256xi32, #tpu.memory_space<vmem>>, vector<1x1x256xi32>
    %6 = vector.shape_cast %5 : vector<1x1x256xi32> to vector<1x256xi32>
    %c0_i32_6 = arith.constant 0 : i32
    %7 = vector.broadcast %c0_i32_6 : i32 to vector<1x256xi32>
    %8 = arith.cmpi sge, %6, %7 : vector<1x256xi32>
    %9 = arith.extui %8 : vector<1x256xi1> to vector<1x256xi32>
    %10 = arith.sitofp %9 : vector<1x256xi32> to vector<1x256xf32>
    %cst = arith.constant dense<0xFF800000> : vector<256xf32>
    %11 = vector.multi_reduction <maximumf>, %4, %cst [0] : vector<4x256xf32> to vector<256xf32>
    %12 = vector.shape_cast %11 : vector<256xf32> to vector<1x256xf32>
    %13 = vector.broadcast %12 : vector<1x256xf32> to vector<4x256xf32>
    %14 = arith.subf %4, %13 : vector<4x256xf32>
    %15 = math.exp %14 : vector<4x256xf32>
    %cst_7 = arith.constant dense<0.000000e+00> : vector<256xf32>
    %16 = vector.multi_reduction <add>, %15, %cst_7 [0] : vector<4x256xf32> to vector<256xf32>
    %17 = vector.shape_cast %16 : vector<256xf32> to vector<1x256xf32>
    %18 = vector.broadcast %17 : vector<1x256xf32> to vector<4x256xf32>
    %19 = arith.divf %15, %18 : vector<4x256xf32>
    %20 = math.log %17 : vector<1x256xf32>
    %21 = arith.addf %12, %20 : vector<1x256xf32>
    %22 = tpu.iota {dimensions = array<i32: 0>} : vector<4x256xi32>
    %23 = vector.broadcast %6 : vector<1x256xi32> to vector<4x256xi32>
    %24 = arith.cmpi eq, %22, %23 : vector<4x256xi32>
    %25 = arith.extui %24 : vector<4x256xi1> to vector<4x256xi32>
    %26 = arith.sitofp %25 : vector<4x256xi32> to vector<4x256xf32>
    %27 = vector.extract_strided_slice %4 {offsets = [0, 0], sizes = [1, 256], strides = [1, 1]} : vector<4x256xf32> to vector<1x256xf32>
    %28 = arith.mulf %4, %26 : vector<4x256xf32>
    %cst_8 = arith.constant dense<0.000000e+00> : vector<256xf32>
    %29 = vector.multi_reduction <add>, %28, %cst_8 [0] : vector<4x256xf32> to vector<256xf32>
    %30 = vector.shape_cast %29 : vector<256xf32> to vector<1x256xf32>
    %31 = arith.mulf %19, %26 : vector<4x256xf32>
    %cst_9 = arith.constant dense<0.000000e+00> : vector<256xf32>
    %32 = vector.multi_reduction <add>, %31, %cst_9 [0] : vector<4x256xf32> to vector<256xf32>
    %33 = vector.shape_cast %32 : vector<256xf32> to vector<1x256xf32>
    %cst_10 = arith.constant 0x7F800000 : f32
    %34 = vector.broadcast %cst_10 : f32 to vector<1x256xf32>
    %35 = arith.select %8, %33, %34 : vector<1x256xi1>, vector<1x256xf32>
    %c0_11 = arith.constant 0 : index
    %c0_12 = arith.constant 0 : index
    %c0_13 = arith.constant 0 : index
    %36 = vector.load %arg4[%c0_11, %c0_12, %c0_13] : memref<1x1x256xf32, #tpu.memory_space<vmem>>, vector<1x1x256xf32>
    %37 = vector.shape_cast %36 : vector<1x1x256xf32> to vector<1x256xf32>
    %38 = vector.shape_cast %35 : vector<1x256xf32> to vector<1x1x256xf32>
    tpu.vector_store %arg4[%c0_11, %c0_12, %c0_13], %38 {strides = array<i32>} : memref<1x1x256xf32, #tpu.memory_space<vmem>>, vector<1x1x256xf32>,
    %39 = arith.subf %30, %27 : vector<1x256xf32>
    %40 = arith.mulf %39, %10 : vector<1x256xf32>
    %c0_14 = arith.constant 0 : index
    %c0_15 = arith.constant 0 : index
    %c0_16 = arith.constant 0 : index
    %41 = vector.load %arg5[%c0_14, %c0_15, %c0_16] : memref<1x1x256xf32, #tpu.memory_space<vmem>>, vector<1x1x256xf32>
    %42 = vector.shape_cast %41 : vector<1x1x256xf32> to vector<1x256xf32>
    %43 = vector.shape_cast %40 : vector<1x256xf32> to vector<1x1x256xf32>
    tpu.vector_store %arg5[%c0_14, %c0_15, %c0_16], %43 {strides = array<i32>} : memref<1x1x256xf32, #tpu.memory_space<vmem>>, vector<1x1x256xf32>,
    %c0_17 = arith.constant 0 : index
    %c0_18 = arith.constant 0 : index
    %c0_19 = arith.constant 0 : index
    %44 = vector.load %arg6[%c0_17, %c0_18, %c0_19] : memref<1x1x128xf32, #tpu.memory_space<vmem>>, vector<1x1x128xf32>
    %45 = vector.shape_cast %44 : vector<1x1x128xf32> to vector<1x128xf32>
    %46 = arith.subf %21, %27 : vector<1x256xf32>
    %47 = arith.mulf %46, %10 : vector<1x256xf32>
    %48 = vector.extract_strided_slice %47 {offsets = [0, 0], sizes = [1, 128], strides = [1, 1]} : vector<1x256xf32> to vector<1x128xf32>
    %49 = vector.extract_strided_slice %47 {offsets = [0, 128], sizes = [1, 128], strides = [1, 1]} : vector<1x256xf32> to vector<1x128xf32>
    %50 = arith.addf %48, %49 : vector<1x128xf32>
    %51 = arith.addf %45, %50 : vector<1x128xf32>
    %c0_20 = arith.constant 0 : index
    %c0_21 = arith.constant 0 : index
    %c0_22 = arith.constant 0 : index
    %52 = vector.load %arg6[%c0_20, %c0_21, %c0_22] : memref<1x1x128xf32, #tpu.memory_space<vmem>>, vector<1x1x128xf32>
    %53 = vector.shape_cast %52 : vector<1x1x128xf32> to vector<1x128xf32>
    %54 = vector.shape_cast %51 : vector<1x128xf32> to vector<1x1x128xf32>
    tpu.vector_store %arg6[%c0_20, %c0_21, %c0_22], %54 {strides = array<i32>} : memref<1x1x128xf32, #tpu.memory_space<vmem>>, vector<1x1x128xf32>,
    %c0_23 = arith.constant 0 : index
    %c0_24 = arith.constant 0 : index
    %c0_25 = arith.constant 0 : index
    %55 = vector.load %arg7[%c0_23, %c0_24, %c0_25] : memref<1x4x128xf32, #tpu.memory_space<vmem>>, vector<1x4x128xf32>
    %56 = vector.shape_cast %55 : vector<1x4x128xf32> to vector<4x128xf32>
    %57 = arith.mulf %19, %26 : vector<4x256xf32>
    %58 = vector.extract_strided_slice %57 {offsets = [0, 0], sizes = [4, 128], strides = [1, 1]} : vector<4x256xf32> to vector<4x128xf32>
    %59 = vector.extract_strided_slice %57 {offsets = [0, 128], sizes = [4, 128], strides = [1, 1]} : vector<4x256xf32> to vector<4x128xf32>
    %60 = arith.addf %58, %59 : vector<4x128xf32>
    %61 = arith.addf %56, %60 : vector<4x128xf32>
    %c0_26 = arith.constant 0 : index
    %c0_27 = arith.constant 0 : index
    %c0_28 = arith.constant 0 : index
    %62 = vector.load %arg7[%c0_26, %c0_27, %c0_28] : memref<1x4x128xf32, #tpu.memory_space<vmem>>, vector<1x4x128xf32>
    %63 = vector.shape_cast %62 : vector<1x4x128xf32> to vector<4x128xf32>
    %64 = vector.shape_cast %61 : vector<4x128xf32> to vector<1x4x128xf32>
    tpu.vector_store %arg7[%c0_26, %c0_27, %c0_28], %64 {strides = array<i32>} : memref<1x4x128xf32, #tpu.memory_space<vmem>>, vector<1x4x128xf32>,
    %c0_29 = arith.constant 0 : index
    %c0_30 = arith.constant 0 : index
    %c0_31 = arith.constant 0 : index
    %65 = vector.load %arg8[%c0_29, %c0_30, %c0_31] : memref<1x4x128xf32, #tpu.memory_space<vmem>>, vector<1x4x128xf32>
    %66 = vector.shape_cast %65 : vector<1x4x128xf32> to vector<4x128xf32>
    %67 = arith.mulf %19, %19 : vector<4x256xf32>
    %68 = vector.broadcast %10 : vector<1x256xf32> to vector<4x256xf32>
    %69 = arith.mulf %67, %68 : vector<4x256xf32>
    %70 = vector.extract_strided_slice %69 {offsets = [0, 0], sizes = [4, 128], strides = [1, 1]} : vector<4x256xf32> to vector<4x128xf32>
    %71 = vector.extract_strided_slice %69 {offsets = [0, 128], sizes = [4, 128], strides = [1, 1]} : vector<4x256xf32> to vector<4x128xf32>
    %72 = arith.addf %70, %71 : vector<4x128xf32>
    %73 = arith.addf %66, %72 : vector<4x128xf32>
    %c0_32 = arith.constant 0 : index
    %c0_33 = arith.constant 0 : index
    %c0_34 = arith.constant 0 : index
    %74 = vector.load %arg8[%c0_32, %c0_33, %c0_34] : memref<1x4x128xf32, #tpu.memory_space<vmem>>, vector<1x4x128xf32>
    %75 = vector.shape_cast %74 : vector<1x4x128xf32> to vector<4x128xf32>
    %76 = vector.shape_cast %73 : vector<4x128xf32> to vector<1x4x128xf32>
    tpu.vector_store %arg8[%c0_32, %c0_33, %c0_34], %76 {strides = array<i32>} : memref<1x4x128xf32, #tpu.memory_space<vmem>>, vector<1x4x128xf32>,
    %c0_35 = arith.constant 0 : index
    %c0_36 = arith.constant 0 : index
    %c0_37 = arith.constant 0 : index
    %77 = vector.load %arg9[%c0_35, %c0_36, %c0_37] : memref<1x4x128xf32, #tpu.memory_space<vmem>>, vector<1x4x128xf32>
    %78 = vector.shape_cast %77 : vector<1x4x128xf32> to vector<4x128xf32>
    %79 = vector.extract_strided_slice %26 {offsets = [0, 0], sizes = [4, 128], strides = [1, 1]} : vector<4x256xf32> to vector<4x128xf32>
    %80 = vector.extract_strided_slice %26 {offsets = [0, 128], sizes = [4, 128], strides = [1, 1]} : vector<4x256xf32> to vector<4x128xf32>
    %81 = arith.addf %79, %80 : vector<4x128xf32>
    %82 = arith.addf %78, %81 : vector<4x128xf32>
    %c0_38 = arith.constant 0 : index
    %c0_39 = arith.constant 0 : index
    %c0_40 = arith.constant 0 : index
    %83 = vector.load %arg9[%c0_38, %c0_39, %c0_40] : memref<1x4x128xf32, #tpu.memory_space<vmem>>, vector<1x4x128xf32>
    %84 = vector.shape_cast %83 : vector<1x4x128xf32> to vector<4x128xf32>
    %85 = vector.shape_cast %82 : vector<4x128xf32> to vector<1x4x128xf32>
    tpu.vector_store %arg9[%c0_38, %c0_39, %c0_40], %85 {strides = array<i32>} : memref<1x4x128xf32, #tpu.memory_space<vmem>>, vector<1x4x128xf32>,
    return
  }
  func.func @transform_0(%arg0: i32, %arg1: i32) -> (i32, i32, i32) {
    %c0_i32 = arith.constant 0 : i32
    %c0_i32_0 = arith.constant 0 : i32
    return %arg0, %c0_i32, %arg1 : i32, i32, i32
  }
  func.func @transform_1(%arg0: i32, %arg1: i32) -> (i32, i32, i32) {
    %c0_i32 = arith.constant 0 : i32
    %c0_i32_0 = arith.constant 0 : i32
    return %arg0, %c0_i32, %arg1 : i32, i32, i32
  }
  func.func @transform_2(%arg0: i32, %arg1: i32) -> (i32, i32, i32) {
    %c0_i32 = arith.constant 0 : i32
    %c0_i32_0 = arith.constant 0 : i32
    return %arg0, %c0_i32, %arg1 : i32, i32, i32
  }
  func.func @transform_3(%arg0: i32, %arg1: i32) -> (i32, i32, i32) {
    %c0_i32 = arith.constant 0 : i32
    %c0_i32_0 = arith.constant 0 : i32
    return %arg0, %c0_i32, %arg1 : i32, i32, i32
  }
  func.func @transform_4(%arg0: i32, %arg1: i32) -> (i32, i32, i32) {
    %c0_i32 = arith.constant 0 : i32
    %c0_i32_0 = arith.constant 0 : i32
    %c0_i32_1 = arith.constant 0 : i32
    return %arg0, %c0_i32, %c0_i32_0 : i32, i32, i32
  }
  func.func @transform_5(%arg0: i32, %arg1: i32) -> (i32, i32, i32) {
    %c0_i32 = arith.constant 0 : i32
    %c0_i32_0 = arith.constant 0 : i32
    %c0_i32_1 = arith.constant 0 : i32
    return %arg0, %c0_i32, %c0_i32_0 : i32, i32, i32
  }
  func.func @transform_6(%arg0: i32, %arg1: i32) -> (i32, i32, i32) {
    %c0_i32 = arith.constant 0 : i32
    %c0_i32_0 = arith.constant 0 : i32
    %c0_i32_1 = arith.constant 0 : i32
    return %arg0, %c0_i32, %c0_i32_0 : i32, i32, i32
  }
  func.func @transform_7(%arg0: i32, %arg1: i32) -> (i32, i32, i32) {
    %c0_i32 = arith.constant 0 : i32
    %c0_i32_0 = arith.constant 0 : i32
    %c0_i32_1 = arith.constant 0 : i32
    return %arg0, %c0_i32, %c0_i32_0 : i32, i32, i32
  }
}

</mosaic_0001>

<bundles_post_ra>
// kernel: tpu_custom_call.1
= control target key start
LH: loop header
LB: loop body
LE: loop exit
PB: predicated region body
PF: predicated region fallthrough
CT: control target
= control target key end

     0   :  { %s2013_s0 = inlined_call_operand.hbm [shape: f32[2,4,256], index: 0, kind: input, shape index: {}]   ;;  %s2014_s1 = inlined_call_operand.hbm [shape: s32[2,1,256], index: 1, kind: input, shape index: {}]   ;;  %s2015_s2 = inlined_call_operand.hbm [shape: f32[2,1,256], index: 2, kind: output, shape index: {0}]   ;;  %s2016_s3 = inlined_call_operand.hbm [shape: f32[2,1,256], index: 3, kind: output, shape index: {1}]   ;;  %s2017_s4 = inlined_call_operand.hbm [shape: f32[2,1,128], index: 4, kind: output, shape index: {2}]   ;;  %s2018_s5 = inlined_call_operand.hbm [shape: f32[2,4,128], index: 5, kind: output, shape index: {3}]   ;;  %s2019_s6 = inlined_call_operand.hbm [shape: f32[2,4,128], index: 6, kind: output, shape index: {4}]   ;;  %s2020_s7 = inlined_call_operand.hbm [shape: f32[2,4,128], index: 7, kind: output, shape index: {5}]  }
   0x1   :  { %2029 = sst [smem:[#allocation26_spill]] %s2013_s0 }
   0x2   :  { %2030 = sst [smem:[#allocation27_spill]] %s2014_s1 }
   0x3   :  { %2031 = sst [smem:[#allocation28_spill]] %s2016_s3 }
   0x4   :  { %2032 = sst [smem:[#allocation29_spill]] %s2020_s7 }
   0x5   :  { %13 = vsyncpa [#allocation3], 0 }
   0x6   :  { %15 = vsyncpa [#allocation3 + $0x1], 0 }
   0x7   :  { %16 = vsyncpa [#allocation6], 0 }
   0x8   :  { %18 = vsyncpa [#allocation6 + $0x1], 0 }
   0x9   :  { %19 = vsyncpa [#allocation4], 0 }
   0xa   :  { %21 = vsyncpa [#allocation4 + $0x1], 0 }
   0xb   :  { %22 = vsyncpa [#allocation9], 0 }
   0xc   :  { %24 = vsyncpa [#allocation9 + $0x1], 0 }
   0xd   :  { %25 = vsyncpa [#allocation12], 0 }
   0xe   :  { %27 = vsyncpa [#allocation12 + $0x1], 0 }
   0xf   :  { %28 = vsyncpa [#allocation15], 0 }
  0x10   :  { %30 = vsyncpa [#allocation15 + $0x1], 0  ;;  %s1490_s24 = smov 0   ;;  %s1492_s25 = smov 0  }
  0x11   :  { %s1494_s26 = smov 0   ;;  %s1496_s27 = smov 0  }
  0x12   :  { %s1498_s28 = smov 0   ;;  %s1500_s29 = smov 0  }
  0x13 LB: > { %2033 = sst [smem:[#allocation22_spill]] %s1426_s26  ;;  %s1521_s30 = sadd.s32 4294967295, %s1438_s29   ;;  %s1438_s29 = sphi %s1500_s29, %s36_s29   ;;  %s1434_s28 = sphi %s1498_s28, %s2062_s28   ;;  %s1430_s27 = sphi %s1496_s27, %s2061_s27   ;;  %s1426_s26 = sphi %s1494_s26, %s2060_s26   ;;  %s1422_s25 = sphi %s1492_s25, %s2064_s25   ;;  %s1418_s24 = sphi %s1490_s24, %s2063_s24  }
  0x14   : > { %2034 = sst [smem:[#allocation23_spill]] %s1434_s28  ;;  %s2021_s8 = sadd.s32 4294967294, %s1438_s29  }
  0x15   : > { %s48_s9 = sadd.s32 1, %s1434_s28  ;;  %s57_s10 = sadd.s32 1, %s1426_s26 }
  0x16   : > { %p50_p0 = scmp.ge.s32.totalorder %s48_s9, 2  ;;  %p64_p1 = scmp.ne.s32.totalorder %s1426_s26, %s1422_s25 }
  0x17   : > { %p65_p2 = scmp.eq.s32.totalorder %s1438_s29, 0  ;;  %p70_p3 = scmp.ne.s32.totalorder %s1422_s25, %s1418_s24 }
  0x18   : > { %s2066_s9 = smov (%p50_p0, %s48_s9), 0  ;;  %p71_p5 = scmp.eq.s32.totalorder %s1521_s30, 0 }
  0x19   : > { %2035 = sst [smem:[#allocation24_spill]] %s2066_s9  ;;  %p1533_p4 = por %p65_p2, %p64_p1 }
  0x1a   : > { %s52_s12 = ssub.s32 %s1434_s28, %s2066_s9  ;;  %p124_p6 = scmp.eq.s32.totalorder %s1521_s30, 1 }
  0x1b   : > { %p55_p7 = scmp.eq.s32.totalorder %s52_s12, 0  ;;  %p1541_p8 = por %p71_p5, %p70_p3 }
  0x1c   : > { %p1545_p9 = por %p124_p6, %p64_p1  ;;  %p130_p10 = scmp.eq.s32.totalorder %s2021_s8, 1 }
  0x1d   : > { %s2037_s13 = scalar_select %p1541_p8, 1, 0 }
  0x1e   : > { %s2038_s14 = scalar_select %p1545_p9, 1, 0 }
  0x1f   : > { %s1552_s15 = scalar_select %p55_p7, %s1426_s26, %s57_s10  }
  0x20   : > { %p1554_p11 = por %p130_p10, %p70_p3  ;;  %p1079_p13 = scmp.lt.s32.totalorder %s1438_s29, 2 }
  0x21   : > { %2039 = sst [smem:[#allocation25_spill]] %s1552_s15  ;;  %s1561_s17 = sand.u32 1, %s1426_s26  }
  0x22   : > { %s2040_s16 = scalar_select %p1554_p11, 1, 0 }
  0x23   : > { %s1001_s18 = sshll.u32 %s1561_s17, 3  ;;  %s1033_s19 = sshll.u32 %s1434_s28, 7 }
  0x24   : > { %s2041_s0 = sld [smem:[#allocation26_spill]]  ;;  %s286_s23 = scalar_lea.vmem [#allocation2], %s1001_s18 }
  0x25   : > { %s296_s10 = sshll.u32 %s286_s23, 4  ;;  %p1574_p0 = pnand %p1079_p13, %p1533_p4  ;;  %s1570_s10 = int_to_ptr.vmem [resolvable:$true] %s296_s10 }
  0x26   : > { %s283_s20 = scalar_lea.sflag [#allocation3], %s1561_s17 }
  0x27   : > { %p1142_p5 = pneg %p1574_p0 }
  0x2a   : > { %s1568_s22 = scalar_lea.hbm %s2041_s0, %s1033_s19  ;;  %s1145_s11 = scalar_lea.hbm %s2041_s0, 256 }
  0x2b   : > { %s1140_s19 = scalar_lea.hbm %s1568_s22, 128  ;;  %p1146_p4 = scmp.lt.u32.totalorder %s1568_s22, %s2041_s0 }
  0x2c   : > { %p1141_p3 = scmp.ne.s32.totalorder %s1568_s22, %s1140_s19  ;;  %p1147_p10 = scmp.lt.u32.totalorder %s1145_s11, %s1140_s19 }
  0x2d   : > { %p1149_p12 = scmp.lt.u32.totalorder %s1140_s19, %s1568_s22 }
  0x2e   : > { %p1143_p6 = pnand %p1142_p5, %p1141_p3  ;;  %p1148_p13 = por %p1147_p10, %p1146_p4 }
  0x30   : > { %p1144_p7 = pneg %p1143_p6  ;;  %p1150_p1 = por %p1149_p12, %p1148_p13 }
  0x32   : > { %p1151_p2 = pnand %p1150_p1, %p1144_p7 }
  0x34   : > { %1154 = shalt.err (!%p1151_p2)
}
  0x35   : > { %s1155_s9 = scalar_lea.vmem %s1570_s10, 128  ;;  %s1440_s18 = smov [#allocation2]  }
  0x36   : > { %p1156_p3 = scmp.ne.s32.totalorder %s1570_s10, %s1155_s9  ;;  %s1160_s21 = sshll.u32 %s1440_s18, 4  ;;  %s1161_s21 = int_to_ptr.vmem [resolvable:$false] %s1160_s21 }
  0x37   : > { %s1162_s8 = scalar_lea.vmem %s1161_s21, 256  ;;  %p1163_p9 = scmp.lt.s32.totalorder %s1570_s10, %s1161_s21 }
  0x38   : > { %p1158_p6 = pnand %p1156_p3, %p1142_p5  ;;  %p1164_p4 = scmp.lt.s32.totalorder %s1162_s8, %s1155_s9 }
  0x3a   : > { %p1159_p11 = pneg %p1158_p6  ;;  %p1165_p10 = por %p1164_p4, %p1163_p9 }
  0x3c   : > { %p1166_p12 = pnand %p1165_p10, %p1159_p11 }
  0x3e   : > { %1169 = shalt.err (!%p1166_p12)
}
  0x3f   : > { %1056 = dma.hbm_to_vmem [thread:$0]  (!%p1574_p0), %s1568_s22, 128, %s1570_s10, %s283_s20  }
  0x40   : > { %p2043_p1 = scmp.lt.s32.totalorder %s1438_s29, 3  ;;  %p2044_p2 = scmp.ge.s32.totalorder %s1438_s29, 1 }
  0x41   : > { %s1004_s9 = sshll.u32 %s1561_s17, 1  ;;  %s1034_s11 = sshll.u32 %s1434_s28, 5 }
  0x42   : > { %p1610_p7 = pnand %p2044_p2, %p2043_p1  ;;  %s2046_s1 = sld [smem:[#allocation27_spill]] }
  0x43   : > { %s307_s8 = scalar_lea.vmem [#allocation5], %s1004_s9  ;;  %s304_s22 = scalar_lea.sflag [#allocation6], %s1561_s17 }
  0x44   : > { %s2045_s19 = scalar_select %p1610_p7, 1, 0 }
  0x45   : > { %s317_s0 = sshll.u32 %s307_s8, 4  ;;  %s318_s0 = int_to_ptr.vmem [resolvable:$true] %s317_s0 }
  0x48   : > { %s1619_s21 = scalar_lea.hbm %s2046_s1, %s1034_s11  ;;  %s1175_s23 = scalar_lea.hbm %s2046_s1, 64 }
  0x49   : > { %s1170_s10 = scalar_lea.hbm %s1619_s21, 32  ;;  %p1176_p3 = scmp.lt.u32.totalorder %s1619_s21, %s2046_s1 }
  0x4a   : > { %p1171_p9 = scmp.ne.s32.totalorder %s1619_s21, %s1170_s10  ;;  %p1177_p6 = scmp.lt.u32.totalorder %s1175_s23, %s1170_s10 }
  0x4b   : > { %p1179_p10 = scmp.lt.u32.totalorder %s1170_s10, %s1619_s21 }
  0x4c   : > { %p1173_p11 = pnand %p1171_p9, %p1142_p5  ;;  %p1178_p4 = por %p1177_p6, %p1176_p3 }
  0x4e   : > { %p1174_p13 = pneg %p1173_p11  ;;  %p1180_p12 = por %p1179_p10, %p1178_p4 }
  0x50   : > { %p1181_p1 = pnand %p1180_p12, %p1174_p13 }
  0x52   : > { %1184 = shalt.err (!%p1181_p1)
}
  0x53   : > { %s1185_s17 = scalar_lea.vmem %s318_s0, 32  ;;  %s1441_s9 = smov [#allocation5]  }
  0x54   : > { %p1186_p2 = scmp.ne.s32.totalorder %s318_s0, %s1185_s17  ;;  %s1190_s28 = sshll.u32 %s1441_s9, 4  ;;  %s1191_s28 = int_to_ptr.vmem [resolvable:$false] %s1190_s28 }
  0x55   : > { %s1192_s8 = scalar_lea.vmem %s1191_s28, 64  ;;  %p1193_p8 = scmp.lt.s32.totalorder %s318_s0, %s1191_s28 }
  0x56   : > { %p1188_p9 = pnand %p1186_p2, %p1142_p5  ;;  %p1194_p7 = scmp.lt.s32.totalorder %s1192_s8, %s1185_s17 }
  0x58   : > { %p1189_p11 = pneg %p1188_p9  ;;  %p1195_p3 = por %p1194_p7, %p1193_p8 }
  0x5a   : > { %p1196_p6 = pnand %p1195_p3, %p1189_p11 }
  0x5c   : > { %1199 = shalt.err (!%p1196_p6)
}
  0x5d   : > { %1059 = dma.hbm_to_vmem [thread:$0]  (!%p1574_p0), %s1619_s21, 32, %s318_s0, %s304_s22  }
  0x5e   : > { %p2047_p13 = scmp.ne.s32.totalorder %s2045_s19, 0 }
  0x5f   : > { %s1644_s10 = sand.u32 (!%p2047_p13), 1, %s1422_s25   ;;  %p2048_p5 = scmp.ne.s32.totalorder (!%p2047_p13), %s2037_s13, 0 }
  0x60   : > { %326 = sbr.rel (%p2047_p13) target bundleno = 296 (0x128), region = 28  ;;  %s1008_s20 = sshll.u32 (!%p2047_p13), %s1644_s10, 3 }
  0x61   : > { %s329_s23 = scalar_lea.sflag (!%p2047_p13), [#allocation3], %s1644_s10  ;;  %s332_s11 = scalar_lea.vmem (!%p2047_p13), [#allocation2], %s1008_s20 }
  0x67   : > { %1393 = dma.done.wait (%p2048_p5), %s329_s23, 128  }
  0x68   : > { %1395 = vsyncadd (%p2048_p5), %s329_s23, 4294967168  ;;  %s1653_s0 = sshll.u32 %s1644_s10, 1  ;;  %s338_s12 = scalar_lea.sflag [#allocation6], %s1644_s10 }
  0x69   : > { %s341_s19 = scalar_lea.vmem [#allocation5], %s1653_s0 }
  0x6a   : > { %1397 = dma.done.wait (%p2048_p5), %s338_s12, 32  }
  0x6b   : > { %1399 = vsyncadd (%p2048_p5), %s338_s12, 4294967264  ;;  %s1012_s21 = sshll.u32 %s1644_s10, 2  ;;  %v472_v0 = vlaneseq  ;;  %s1663_s22 = scalar_lea.vmem [#allocation10], %s1644_s10  ;;  %v1442_v1 = vmov 0.0   ;;  %vm421_vm0 = vcmask 1043456   ;;  %v1686_v5 = vld [vmem:[%s332_s11] sm:$0xff] }
  0x6c   : > { %409 = vst [vmem:[%s1663_s22] sm:$0x1] %v1442_v1  ;;  %s1667_s18 = scalar_lea.vmem [#allocation11], %s1012_s21  ;;  %s1674_s13 = scalar_lea.vmem [#allocation13], %s1012_s21  ;;  %v1688_v6 = vld [vmem:[%s341_s19] sm:$0x3]  ;;  %v419_v7 = vcombine.high %v1686_v5, %v1686_v5  ;;  %v422_v8 = vsel %vm421_vm0, %v1686_v5, -inf }
  0x6d   : > { %410 = vst [vmem:[%s1667_s18] sm:$0xf] %v1442_v1  ;;  %v1672_v2 = vshrl.u32 %v472_v0, 7  ;;  %411 = vst [vmem:[%s1674_s13] sm:$0xf] %v1442_v1  ;;  %s1678_s17 = scalar_lea.vmem [#allocation14], %s1012_s21  ;;  %v423_v10 = vrot.slane %v422_v8, 4  ;;  %s1706_s9 = sshll.u32 %s1430_s27, 6 }
  0x6e   : > { %412 = vst [vmem:[%s1678_s17] sm:$0xf] %v1442_v1  ;;  %v429_v12 = vsel %vm421_vm0, %v419_v7, -inf  ;;  %s2049_s7 = sld [smem:[#allocation29_spill]]  ;;  %s734_s23 = sshll.u32 %s1678_s17, 4  ;;  %s1719_s23 = int_to_ptr.vmem [resolvable:$true] %s734_s23 }
  0x6f   : > { %v1683_v3 = vsub.s32 0, %v1672_v2  ;;  %v480_v4 = vsub.s32 1, %v1672_v2  ;;  %v424_v13 = vmax.f32 %v422_v8, %v423_v10  ;;  %v430_v14 = vrot.slane %v429_v12, 4  ;;  %s650_s11 = scalar_lea.sflag [#allocation15], %s1644_s10  ;;  %s1200_s12 = scalar_lea.vmem %s1719_s23, 64 }
  0x70   : > { %p1201_p8 = scmp.ne.s32.totalorder %s1719_s23, %s1200_s12  ;;  %p2050_p0 = scmp.ne.s32.totalorder %s2038_s14, 0 }
  0x71   : > { %v477_v9 = vrot.slane %v1688_v6, %v1683_v3  ;;  %v481_v11 = vrot.slane %v1688_v6, %v480_v4  ;;  %v425_v18 = vrot.slane %v424_v13, 2  ;;  %v431_v19 = vmax.f32 %v429_v12, %v430_v14  ;;  %s1443_s19 = smov [#allocation14]  }
  0x72   : > { %p1202_p7 = pnand %p1201_p8, %p2050_p0  ;;  %s1204_s21 = sshll.u32 %s1443_s19, 4  ;;  %s1205_s21 = int_to_ptr.vmem [resolvable:$false] %s1204_s21 }
  0x73   : > { %vm482_vm1 = vcmp.eq.s32.totalorder %v1672_v2, %v477_v9  ;;  %vm483_vm2 = vcmp.eq.s32.totalorder %v1672_v2, %v481_v11  ;;  %v426_v22 = vmax.f32 %v424_v13, %v425_v18  ;;  %v432_v23 = vrot.slane %v431_v19, 2  ;;  %s1206_s28 = scalar_lea.vmem %s1205_s21, 128  ;;  %p1207_p10 = scmp.lt.s32.totalorder %s1719_s23, %s1205_s21 }
  0x74   : > { %v1016_v15 = vsel %vm482_vm1, 1.0, %v1442_v1  ;;  %v1017_v16 = vsel %vm483_vm2, 1.0, %v1442_v1  ;;  %s1716_s20 = scalar_lea.hbm %s2049_s7, %s1706_s9  ;;  %p1203_p4 = pneg %p1202_p7 }
  0x75   : > { %v621_v17 = vld [vmem:[%s1678_s17] sm:$0xf]  ;;  %v1708_v20 = vcombine.low %v1016_v15, %v1017_v16  ;;  %v622_v21 = vadd.f32 %v1017_v16, %v1016_v15  ;;  %v427_v26 = vrot.slane %v426_v22, 1  ;;  %v433_v27 = vmax.f32 %v431_v19, %v432_v23  ;;  %p1208_p12 = scmp.lt.s32.totalorder %s1206_s28, %s1200_s12 }
  0x77   : > { %v492_v24 = vmul.f32 %v1708_v20, %v1686_v5  ;;  %v623_v25 = vadd.f32 %v622_v21, %v621_v17  ;;  %p1209_p1 = por %p1208_p12, %p1207_p10 }
  0x79   : > { %v494_v28 = vcombine.high %v492_v24, %v492_v24  ;;  %v496_v29 = vsel %vm421_vm0, %v492_v24, 0.0  ;;  %624 = vst [vmem:[%s1678_s17] sm:$0xf] %v623_v25  ;;  %p1210_p2 = pnand %p1209_p1, %p1203_p4 }
  0x7a   : > { %v497_v30 = vrot.slane %v496_v29, 4 }
  0x7b   : > { %1213 = shalt.err (!%p1210_p2)
}
  0x7c   : > { %s1214_s17 = scalar_lea.hbm %s1716_s20, 64  ;;  %s1218_s19 = scalar_lea.hbm %s2049_s7, 128 }
  0x7d   : > { %p1215_p9 = scmp.ne.s32.totalorder %s1716_s20, %s1214_s17  ;;  %p1219_p6 = scmp.lt.u32.totalorder %s1716_s20, %s2049_s7 }
  0x7e   : > { %p1220_p13 = scmp.lt.u32.totalorder %s1218_s19, %s1214_s17  ;;  %p1222_p8 = scmp.lt.u32.totalorder %s1214_s17, %s1716_s20 }
  0x7f   : > { %p1216_p11 = pnand %p1215_p9, %p2050_p0 }
  0x80   : > { %p1221_p5 = por %p1220_p13, %p1219_p6 }
  0x81   : > { %p1217_p3 = pneg %p1216_p11 }
  0x82   : > { %p1223_p7 = por %p1222_p8, %p1221_p5 }
  0x84   : > { %p1224_p4 = pnand %p1223_p7, %p1217_p3 }
  0x86   : > { %1227 = shalt.err (!%p1224_p4)
}
  0x87   : > { %1046 = dma.vmem_to_hbm [thread:$0]  (%p2050_p0), %s1719_s23, 64, %s1716_s20, %s650_s11   ;;  %v1745_v31 = vmax.f32 %v426_v22, %v427_v26  ;;  %v434_v32 = vrot.slane %v433_v27, 1  ;;  %v503_v33 = vsel %vm421_vm0, %v494_v28, 0.0  ;;  %v498_v34 = vadd.f32 %v497_v30, %v496_v29 }
  0x88   : > { %v504_v35 = vrot.slane %v503_v33, 4  ;;  %vm415_vm3 = vcmp.ge.s32.totalorder %v1688_v6, 0  ;;  %v558_v42 = vsub.s32 4, %v1672_v2  ;;  %v1444_v47 = vmov 1966171168   ;;  %s373_s1 = scalar_lea.vmem [#allocation8], %s1653_s0 }
  0x89   : > { %v1748_v36 = vmax.f32 %v433_v27, %v434_v32  ;;  %v499_v37 = vrot.slane %v498_v34, 2  ;;  %v1015_v43 = vsel %vm415_vm3, 1.0, %v1442_v1  ;;  %v532_v48 = vunpack.c.l.s4 %v1444_v47  ;;  %s682_s15 = sshll.u32 %s373_s1, 4  ;;  %s2027_s20 = sand.u32 1, %s1521_s30   ;;  %s1788_s15 = int_to_ptr.vmem [resolvable:$true] %s682_s15 }
  0x8a   : > { %v505_v38 = vadd.f32 %v504_v35, %v503_v33  ;;  %v1760_v49 = vrot.slane %v1686_v5, %v1683_v3  ;;  %v1763_v53 = vrot.slane %v1686_v5, %v558_v42  ;;  %v1766_v54 = vrot.slane %v1015_v43, %v1683_v3  ;;  %s2026_s23 = sshll.u32 %s1430_s27, 5  ;;  %s2053_s3 = sld [smem:[#allocation28_spill]] }
  0x8b   : > { %v438_v39 = vcombine.low %v1745_v31, %v1748_v36  ;;  %v500_v40 = vadd.f32 %v499_v37, %v498_v34  ;;  %v533_v56 = vunpack.c.0.s8 %v532_v48  ;;  %v1771_v58 = vrot.slane %v1015_v43, %v480_v4  ;;  %s1804_s17 = scalar_lea.sflag [#allocation9], %s2027_s20  ;;  %s1228_s8 = scalar_lea.vmem %s1788_s15, 32 }
  0x8c   : > { %v506_v41 = vrot.slane %v505_v38, 2  ;;  %vm1784_vm4 = vcmp.lt.s32.totalorder %v472_v0, 256  ;;  %p1229_p10 = scmp.ne.s32.totalorder %s1788_s15, %s1228_s8  ;;  %s1445_s19 = smov [#allocation8]  }
  0x8d   : > { %v440_v44 = vsub.f32 %v1686_v5, %v438_v39  ;;  %v501_v45 = vrot.slane %v500_v40, 1  ;;  %v1776_v61 = vsub.s32 %v533_v56, %v1672_v2  ;;  %s1232_s21 = sshll.u32 %s1445_s19, 4  ;;  %s1233_s21 = int_to_ptr.vmem [resolvable:$false] %s1232_s21 }
  0x8e   : > { %v507_v46 = vadd.f32 %v506_v41, %v505_v38  ;;  %p1230_p12 = pnand %p1229_p10, %p2050_p0  ;;  %s1234_s11 = scalar_lea.vmem %s1233_s21, 64 }
  0x8f   : > { %v441_v50 = vmul.f32 1.442695, %v440_v44  ;;  %v502_v51 = vadd.f32 %v501_v45, %v500_v40  ;;  %p1235_p2 = scmp.lt.s32.totalorder %s1788_s15, %s1233_s21  ;;  %p1236_p9 = scmp.lt.s32.totalorder %s1234_s11, %s1228_s8 }
  0x90   : > { %v508_v52 = vrot.slane %v507_v46, 1  ;;  %s1797_s28 = scalar_lea.hbm %s2053_s3, %s2026_s23  ;;  %p1231_p1 = pneg %p1230_p12 }
  0x91   : > { %1132 = vpow2.f32 %v441_v50  ;;  %v562_v57 = vsub.f32 %v502_v51, %v1760_v49  ;;  %p1237_p11 = por %p1236_p9, %p1235_p2 }
  0x92   : > { %v509_v55 = vadd.f32 %v508_v52, %v507_v46 }
  0x93   : > { %v575_v60 = vmul.f32 %v1766_v54, %v562_v57  ;;  %p1238_p3 = pnand %p1237_p11, %p1231_p1 }
  0x94   : > { %v563_v59 = vsub.f32 %v509_v55, %v1763_v53 }
  0x96   : > { %v576_v62 = vmul.f32 %v1771_v58, %v563_v59 }
  0x98   : > { %v579_v63 = vcombine.low %v575_v60, %v576_v62 }
  0x9a   : > { %v586_v1 = vrot.slane %v579_v63, %v1776_v61 }
  0x9b   : > { %v1133_v3 = vpop.eup %1132 }
  0x9c   : > { %v593_v2 = vrot.slane %v586_v1, %v1776_v61  ;;  %v444_v5 = vcombine.high %v1133_v3, %v1133_v3  ;;  %v446_v7 = vsel %vm421_vm0, %v1133_v3, 0.0 }
  0x9d   : > { %v447_v0 = vrot.slane %v446_v7, 4 }
  0x9e   : > { %595 = vst.msk [vmem:[%s373_s1] sm:$0x3] %vm1784_vm4, %v593_v2  ;;  %v453_v8 = vsel %vm421_vm0, %v444_v5, 0.0 }
  0x9f   : > { %v448_v9 = vadd.f32 %v447_v0, %v446_v7  ;;  %v454_v10 = vrot.slane %v453_v8, 4 }
  0xa0   : > { %1241 = shalt.err (!%p1238_p3)
}
  0xa1   : > { %s1242_s1 = scalar_lea.hbm %s1797_s28, 32  ;;  %s1246_s19 = scalar_lea.hbm %s2053_s3, 64 }
  0xa2   : > { %p1243_p6 = scmp.ne.s32.totalorder %s1797_s28, %s1242_s1  ;;  %p1247_p8 = scmp.lt.u32.totalorder %s1797_s28, %s2053_s3 }
  0xa3   : > { %p1248_p7 = scmp.lt.u32.totalorder %s1246_s19, %s1242_s1  ;;  %p1250_p10 = scmp.lt.u32.totalorder %s1242_s1, %s1797_s28 }
  0xa4   : > { %p1244_p13 = pnand %p1243_p6, %p2050_p0 }
  0xa5   : > { %p1249_p4 = por %p1248_p7, %p1247_p8 }
  0xa6   : > { %p1245_p5 = pneg %p1244_p13 }
  0xa7   : > { %p1251_p12 = por %p1250_p10, %p1249_p4 }
  0xa9   : > { %p1252_p1 = pnand %p1251_p12, %p1245_p5 }
  0xab   : > { %1255 = shalt.err (!%p1252_p1)
}
  0xac   : > { %1042 = dma.vmem_to_hbm [thread:$0]  (%p2050_p0), %s1788_s15, 32, %s1797_s28, %s1804_s17   ;;  %v449_v11 = vrot.slane %v448_v9, 2  ;;  %v455_v12 = vadd.f32 %v454_v10, %v453_v8  ;;  %v612_v32 = vcombine.low %v1766_v54, %v1771_v58  ;;  %v604_v40 = vld [vmem:[%s1667_s18] sm:$0xf]  ;;  %v610_v51 = vld [vmem:[%s1674_s13] sm:$0xf] }
  0xad   : > { %v596_v42 = vld [vmem:[%s1663_s22] sm:$0x1]  ;;  %s708_s15 = sshll.u32 %s1667_s18, 4  ;;  %s695_s20 = sshll.u32 %s1663_s22, 4  ;;  %s1852_s15 = int_to_ptr.vmem [resolvable:$true] %s708_s15  ;;  %s1854_s20 = int_to_ptr.vmem [resolvable:$true] %s695_s20 }
  0xae   : > { %v450_v13 = vadd.f32 %v449_v11, %v448_v9  ;;  %v456_v14 = vrot.slane %v455_v12, 2  ;;  %s1027_s23 = sshll.u32 %s1430_s27, 4  ;;  %s721_s28 = sshll.u32 %s1674_s13, 4  ;;  %s1863_s28 = int_to_ptr.vmem [resolvable:$true] %s721_s28 }
  0xaf   : > { %s1850_s1 = scalar_lea.hbm %s2018_s5, %s1706_s9  ;;  %s1861_s21 = scalar_lea.hbm %s2017_s4, %s1027_s23 }
  0xb0   : > { %v451_v15 = vrot.slane %v450_v13, 1  ;;  %v457_v16 = vadd.f32 %v456_v14, %v455_v12  ;;  %s1871_s3 = scalar_lea.hbm %s2019_s6, %s1706_s9  ;;  %s2054_s7 = sand.u32 1, %s1521_s30  }
  0xb1   : > { %s1878_s26 = scalar_lea.sflag [#allocation12], %s2054_s7  ;;  %s1256_s23 = scalar_lea.vmem %s1852_s15, 64 }
  0xb2   : > { %v452_v17 = vadd.f32 %v451_v15, %v450_v13  ;;  %v458_v18 = vrot.slane %v457_v16, 1  ;;  %p1257_p2 = scmp.ne.s32.totalorder %s1852_s15, %s1256_s23 }
  0xb4   : > { %v459_v19 = vadd.f32 %v458_v18, %v457_v16  ;;  %1134 = vlog2.f32 %v452_v17  ;;  %p1258_p9 = pnand %p1257_p2, %p2050_p0 }
  0xb6   : > { %v462_v21 = vcombine.low %v452_v17, %v459_v19  ;;  %1136 = vlog2.f32 %v459_v19  ;;  %p1259_p11 = pneg %p1258_p9 }
  0xb8   : > { %1138 = vrcp.f32 %v462_v21 }
  0xbe   : > { %v1135_v22 = vpop.eup %1134 }
  0xbf   : > { %v467_v23 = vmul.f32 0.6931472, %v1135_v22 }
  0xc0   : > { %v1137_v24 = vpop.eup %1136 }
  0xc1   : > { %v469_v25 = vmul.f32 0.6931472, %v1137_v24  ;;  %v470_v26 = vadd.f32 %v467_v23, %v1745_v31 }
  0xc2   : > { %v1139_v27 = vpop.eup %1138 }
  0xc3   : > { %v465_v28 = vmul.f32 %v1139_v27, %v1133_v3  ;;  %v471_v29 = vadd.f32 %v469_v25, %v1748_v36  ;;  %v597_v30 = vsub.f32 %v470_v26, %v1760_v49 }
  0xc5   : > { %v510_v33 = vmul.f32 %v1708_v20, %v465_v28  ;;  %v598_v34 = vsub.f32 %v471_v29, %v1763_v53  ;;  %v599_v35 = vmul.f32 %v597_v30, %v1766_v54  ;;  %v611_v31 = vmul.f32 %v465_v28, %v465_v28 }
  0xc7   : > { %v605_v37 = vrot.slane %v510_v33, 4  ;;  %v512_v38 = vcombine.high %v510_v33, %v510_v33  ;;  %v514_v39 = vsel %vm421_vm0, %v510_v33, 0.0  ;;  %v600_v36 = vmul.f32 %v598_v34, %v1771_v58 }
  0xc8   : > { %v515_v41 = vrot.slane %v514_v39, 4  ;;  %v614_v43 = vmul.f32 %v612_v32, %v611_v31 }
  0xc9   : > { %v607_v20 = vadd.f32 %v605_v37, %v510_v33  ;;  %v521_v44 = vsel %vm421_vm0, %v512_v38, 0.0  ;;  %v601_v45 = vadd.f32 %v600_v36, %v599_v35 }
  0xca   : > { %v516_v46 = vadd.f32 %v515_v41, %v514_v39  ;;  %v522_v47 = vrot.slane %v521_v44, 4  ;;  %v616_v48 = vrot.slane %v614_v43, 4 }
  0xcb   : > { %v608_v49 = vadd.f32 %v607_v20, %v604_v40  ;;  %v602_v50 = vadd.f32 %v601_v45, %v596_v42 }
  0xcc   : > { %v517_v52 = vrot.slane %v516_v46, 2  ;;  %v1856_v53 = vadd.f32 %v522_v47, %v521_v44  ;;  %v618_v54 = vadd.f32 %v616_v48, %v614_v43 }
  0xcd   : > { %609 = vst [vmem:[%s1667_s18] sm:$0xf] %v608_v49  ;;  %603 = vst [vmem:[%s1663_s22] sm:$0x1] %v602_v50  ;;  %s1446_s18 = smov [#allocation11]  }
  0xce   : > { %v1873_v55 = vadd.f32 %v517_v52, %v516_v46  ;;  %v524_v56 = vrot.slane %v1856_v53, 2  ;;  %v619_v57 = vadd.f32 %v618_v54, %v610_v51  ;;  %s1260_s22 = sshll.u32 %s1446_s18, 4  ;;  %s1261_s22 = int_to_ptr.vmem [resolvable:$false] %s1260_s22 }
  0xcf   : > { %s1262_s12 = scalar_lea.vmem %s1261_s22, 128  ;;  %p1263_p3 = scmp.lt.s32.totalorder %s1852_s15, %s1261_s22 }
  0xd0   : > { %p1264_p6 = scmp.lt.s32.totalorder %s1262_s12, %s1256_s23 }
  0xd2   : > { %p1265_p13 = por %p1264_p6, %p1263_p3 }
  0xd4   : > { %p1266_p5 = pnand %p1265_p13, %p1259_p11 }
  0xd6   : > { %1269 = shalt.err (!%p1266_p5)
}
  0xd7   : > { %s1270_s7 = scalar_lea.hbm %s1850_s1, 64  ;;  %s1274_s19 = scalar_lea.hbm %s2018_s5, 128 }
  0xd8   : > { %p1271_p8 = scmp.ne.s32.totalorder %s1850_s1, %s1270_s7  ;;  %p1275_p10 = scmp.lt.u32.totalorder %s1850_s1, %s2018_s5 }
  0xd9   : > { %p1276_p12 = scmp.lt.u32.totalorder %s1274_s19, %s1270_s7  ;;  %p1278_p2 = scmp.lt.u32.totalorder %s1270_s7, %s1850_s1 }
  0xda   : > { %p1272_p7 = pnand %p1271_p8, %p2050_p0 }
  0xdb   : > { %p1277_p1 = por %p1276_p12, %p1275_p10 }
  0xdc   : > { %p1273_p4 = pneg %p1272_p7 }
  0xdd   : > { %p1279_p9 = por %p1278_p2, %p1277_p1 }
  0xdf   : > { %p1280_p11 = pnand %p1279_p9, %p1273_p4 }
  0xe1   : > { %1283 = shalt.err (!%p1280_p11)
}
  0xe2   : > { %1044 = dma.vmem_to_hbm [thread:$0]  (%p2050_p0), %s1852_s15, 64, %s1850_s1, %s1878_s26  }
  0xe3   : > { %s1284_s23 = scalar_lea.vmem %s1854_s20, 16  ;;  %s1447_s18 = smov [#allocation10]  }
  0xe4   : > { %p1285_p3 = scmp.ne.s32.totalorder %s1854_s20, %s1284_s23  ;;  %s1288_s22 = sshll.u32 %s1447_s18, 4  ;;  %s1289_s22 = int_to_ptr.vmem [resolvable:$false] %s1288_s22 }
  0xe5   : > { %s1290_s12 = scalar_lea.vmem %s1289_s22, 32  ;;  %p1291_p5 = scmp.lt.s32.totalorder %s1854_s20, %s1289_s22 }
  0xe6   : > { %p1286_p6 = pnand %p1285_p3, %p2050_p0  ;;  %p1292_p8 = scmp.lt.s32.totalorder %s1290_s12, %s1284_s23 }
  0xe8   : > { %p1287_p13 = pneg %p1286_p6  ;;  %p1293_p7 = por %p1292_p8, %p1291_p5 }
  0xea   : > { %p1294_p4 = pnand %p1293_p7, %p1287_p13 }
  0xec   : > { %1297 = shalt.err (!%p1294_p4)
}
  0xed   : > { %s1298_s15 = scalar_lea.hbm %s1861_s21, 16  ;;  %s1302_s30 = scalar_lea.hbm %s2017_s4, 32 }
  0xee   : > { %p1299_p10 = scmp.ne.s32.totalorder %s1861_s21, %s1298_s15  ;;  %p1303_p2 = scmp.lt.u32.totalorder %s1861_s21, %s2017_s4 }
  0xef   : > { %p1304_p9 = scmp.lt.u32.totalorder %s1302_s30, %s1298_s15  ;;  %p1306_p3 = scmp.lt.u32.totalorder %s1298_s15, %s1861_s21 }
  0xf0   : > { %p1300_p12 = pnand %p1299_p10, %p2050_p0 }
  0xf1   : > { %p1305_p11 = por %p1304_p9, %p1303_p2 }
  0xf2   : > { %p1301_p1 = pneg %p1300_p12 }
  0xf3   : > { %p1307_p6 = por %p1306_p3, %p1305_p11 }
  0xf5   : > { %p1308_p13 = pnand %p1307_p6, %p1301_p1 }
  0xf7   : > { %1311 = shalt.err (!%p1308_p13)
}
  0xf8   : > { %1043 = dma.vmem_to_hbm [thread:$0]  (%p2050_p0), %s1854_s20, 16, %s1861_s21, %s1804_s17   ;;  %v519_v58 = vrot.slane %v1873_v55, 1  ;;  %v525_v59 = vadd.f32 %v524_v56, %v1856_v53  ;;  %620 = vst [vmem:[%s1674_s13] sm:$0xf] %v619_v57 }
  0xf9   : > { %s1312_s8 = scalar_lea.vmem %s1863_s28, 64  ;;  %s1448_s11 = smov [#allocation13]  }
  0xfa   : > { %p1313_p5 = scmp.ne.s32.totalorder %s1863_s28, %s1312_s8  ;;  %s1316_s23 = sshll.u32 %s1448_s11, 4  ;;  %s1317_s23 = int_to_ptr.vmem [resolvable:$false] %s1316_s23 }
  0xfb   : > { %s1318_s18 = scalar_lea.vmem %s1317_s23, 128  ;;  %p1319_p4 = scmp.lt.s32.totalorder %s1863_s28, %s1317_s23 }
  0xfc   : > { %p1314_p8 = pnand %p1313_p5, %p2050_p0  ;;  %p1320_p10 = scmp.lt.s32.totalorder %s1318_s18, %s1312_s8 }
  0xfe   : > { %p1315_p7 = pneg %p1314_p8  ;;  %p1321_p12 = por %p1320_p10, %p1319_p4 }
 0x100   : > { %p1322_p1 = pnand %p1321_p12, %p1315_p7 }
 0x102   : > { %1325 = shalt.err (!%p1322_p1)
}
 0x103   : > { %s1326_s13 = scalar_lea.hbm %s1871_s3, 64  ;;  %s1330_s21 = scalar_lea.hbm %s2019_s6, 128 }
 0x104   : > { %p1327_p2 = scmp.ne.s32.totalorder %s1871_s3, %s1326_s13  ;;  %p1331_p3 = scmp.lt.u32.totalorder %s1871_s3, %s2019_s6 }
 0x105   : > { %p1332_p6 = scmp.lt.u32.totalorder %s1330_s21, %s1326_s13  ;;  %p1334_p5 = scmp.lt.u32.totalorder %s1326_s13, %s1871_s3 }
 0x106   : > { %p1328_p9 = pnand %p1327_p2, %p2050_p0 }
 0x107   : > { %p1333_p13 = por %p1332_p6, %p1331_p3 }
 0x108   : > { %p1329_p11 = pneg %p1328_p9 }
 0x109   : > { %p1335_p8 = por %p1334_p5, %p1333_p13 }
 0x10b   : > { %p1336_p7 = pnand %p1335_p8, %p1329_p11 }
 0x10d   : > { %1339 = shalt.err (!%p1336_p7)
}
 0x10e   : > { %1045 = dma.vmem_to_hbm [thread:$0]  (%p2050_p0), %s1863_s28, 64, %s1871_s3, %s1878_s26   ;;  %v520_v60 = vadd.f32 %v519_v58, %v1873_v55  ;;  %v526_v62 = vrot.slane %v525_v59, 1 }
 0x10f   : > { %s366_s15 = scalar_lea.vmem [#allocation7], %s1653_s0  ;;  %s2055_s7 = sshll.u32 %s1430_s27, 5 }
 0x110   : > { %v527_v63 = vadd.f32 %v526_v62, %v525_v59  ;;  %s666_s1 = sshll.u32 %s366_s15, 4  ;;  %s1960_s3 = scalar_lea.hbm %s2015_s2, %s2055_s7  ;;  %s1953_s1 = int_to_ptr.vmem [resolvable:$true] %s666_s1 }
 0x111   : > { %s626_s26 = scalar_lea.sflag [#allocation4], %s1644_s10  ;;  %s1340_s0 = scalar_lea.vmem %s1953_s1, 32 }
 0x112   : > { %v530_v1 = vcombine.low %v520_v60, %v527_v63  ;;  %p1341_p4 = scmp.ne.s32.totalorder %s1953_s1, %s1340_s0  ;;  %s1449_s27 = smov [#allocation7]  }
 0x113   : > { %s1344_s28 = sshll.u32 %s1449_s27, 4  ;;  %s1345_s28 = int_to_ptr.vmem [resolvable:$false] %s1344_s28 }
 0x114   : > { %v537_v3 = vrot.slane %v530_v1, %v1776_v61  ;;  %p1342_p10 = pnand %p1341_p4, %p2050_p0  ;;  %s1346_s19 = scalar_lea.vmem %s1345_s28, 64 }
 0x115   : > { %p1347_p1 = scmp.lt.s32.totalorder %s1953_s1, %s1345_s28  ;;  %p1348_p2 = scmp.lt.s32.totalorder %s1346_s19, %s1340_s0 }
 0x116   : > { %v544_v2 = vrot.slane %v537_v3, %v1776_v61  ;;  %p1343_p12 = pneg %p1342_p10 }
 0x117   : > { %p1349_p9 = por %p1348_p2, %p1347_p1 }
 0x118   : > { %v546_v5 = vsel %vm415_vm3, %v544_v2, inf }
 0x119   : > { %551 = vst.msk [vmem:[%s366_s15] sm:$0x3] %vm1784_vm4, %v546_v5  ;;  %p1350_p11 = pnand %p1349_p9, %p1343_p12 }
 0x11b   : > { %1353 = shalt.err (!%p1350_p11)
}
 0x11c   : > { %s1354_s10 = scalar_lea.hbm %s1960_s3, 32  ;;  %s1358_s23 = scalar_lea.hbm %s2015_s2, 64 }
 0x11d   : > { %p1355_p3 = scmp.ne.s32.totalorder %s1960_s3, %s1354_s10  ;;  %p1359_p5 = scmp.lt.u32.totalorder %s1960_s3, %s2015_s2 }
 0x11e   : > { %p1360_p8 = scmp.lt.u32.totalorder %s1358_s23, %s1354_s10  ;;  %p1362_p4 = scmp.lt.u32.totalorder %s1354_s10, %s1960_s3 }
 0x11f   : > { %p1356_p6 = pnand %p1355_p3, %p2050_p0 }
 0x120   : > { %p1361_p7 = por %p1360_p8, %p1359_p5 }
 0x121   : > { %p1357_p13 = pneg %p1356_p6 }
 0x122   : > { %p1363_p10 = por %p1362_p4, %p1361_p7 }
 0x124   : > { %p1364_p12 = pnand %p1363_p10, %p1357_p13 }
 0x126   : > { %1367 = shalt.err (!%p1364_p12)
}
 0x127   : > { %1041 = dma.vmem_to_hbm [thread:$0]  (%p2050_p0), %s1953_s1, 32, %s1960_s3, %s626_s26  }
 0x128 PF: > { %s746_s17 = sand.u32 1, %s1418_s24   ;;  %p2056_p1 = scmp.ne.s32.totalorder %s2040_s16, 0 }
 0x129   : > { %p2057_p2 = scmp.ge.s32.totalorder %s1438_s29, 2  ;;  %s747_s20 = scalar_lea.sflag [#allocation4], %s746_s17 }
 0x12b   : > { %p1061_p9 = pnand %p2057_p2, %p2056_p1 }
 0x12d   : > { %1401 = dma.done.wait (!%p1061_p9), %s747_s20, 32  }
 0x12e   : > { %1403 = vsyncadd (!%p1061_p9), %s747_s20, 4294967264  ;;  %s2058_s21 = sadd.s32 4294967294, %s1438_s29  }
 0x12f   : > { %s755_s22 = sand.u32 1, %s2058_s21  }
 0x130   : > { %s756_s12 = scalar_lea.sflag [#allocation9], %s755_s22 }
 0x131   : > { %1405 = dma.done.wait (!%p1061_p9), %s756_s12, 48  }
 0x132   : > { %1407 = vsyncadd (!%p1061_p9), %s756_s12, 4294967248  ;;  %s773_s14 = scalar_lea.sflag [#allocation12], %s755_s22 }
 0x133   : > { %1409 = dma.done.wait (!%p1061_p9), %s773_s14, 128  }
 0x134   : > { %1411 = vsyncadd (!%p1061_p9), %s773_s14, 4294967168  ;;  %s791_s15 = scalar_lea.sflag [#allocation15], %s746_s17 }
 0x135   : > { %1413 = dma.done.wait (!%p1061_p9), %s791_s15, 64  }
 0x136   : > { %1415 = vsyncadd (!%p1061_p9), %s791_s15, 4294967232  ;;  %s36_s29 = sadd.s32 1, %s1438_s29   ;;  %s2059_s16 = sld [smem:[#allocation22_spill]] }
 0x137   : > { %p33_p0 = scmp.ge.s32.totalorder %s36_s29, 4   ;;  %s2060_s26 = sld [smem:[#allocation25_spill]] }
 0x138   : > { %s2061_s27 = sld [smem:[#allocation23_spill]]  ;;  %s2062_s28 = sld [smem:[#allocation24_spill]] }
 0x139   : > { %s2063_s24 = smov %s1422_s25  ;;  %35 = sbr.rel (!%p33_p0) target bundleno = 19 (0x13), region = 171 }
 0x13c   : > { %s2064_s25 = smov %s2059_s16 }
 0x140   :  { %796 = vsyncpa [#allocation3], 1 }
 0x141   :  { %798 = vsyncpa [#allocation3 + $0x1], 1 }
 0x142   :  { %799 = vsyncpa [#allocation6], 1 }
 0x143   :  { %801 = vsyncpa [#allocation6 + $0x1], 1 }
 0x144   :  { %802 = vsyncpa [#allocation4], 1 }
 0x145   :  { %804 = vsyncpa [#allocation4 + $0x1], 1 }
 0x146   :  { %805 = vsyncpa [#allocation9], 1 }
 0x147   :  { %807 = vsyncpa [#allocation9 + $0x1], 1 }
 0x148   :  { %808 = vsyncpa [#allocation12], 1 }
 0x149   :  { %810 = vsyncpa [#allocation12 + $0x1], 1 }
 0x14a   :  { %811 = vsyncpa [#allocation15], 1 }
 0x14b   :  { %813 = vsyncpa [#allocation15 + $0x1], 1 }

</bundles_post_ra>
